<compile_context>
chip_gen: v6e
topology: v6e:2x2x1
jax: 0.10.0
libtpu: 0.0.40
codegen_flags: <defaults>
</compile_context>

<pallas_src>
import functools

import jax
import jax.numpy as jnp
import numpy as np
from jax.experimental import pallas as pl
from jax.experimental.pallas import tpu as pltpu

ALPHA = 0.25
GAMMA = 2.0  # statically 2.0 -> strength-reduced to a square inside the kernel


def _round_up(x, m):
    return ((x + m - 1) // m) * m


def _focal_loss_kernel(loc_p_ref, loc_t_ref, cls_p_ref, cls_t_ref,
                       loss_out_ref, pos_out_ref,
                       loc_acc, cls_acc, pos_acc):
    step = pl.program_id(1)

    @pl.when(step == 0)
    def _():
        loc_acc[...] = jnp.zeros_like(loc_acc)
        cls_acc[...] = jnp.zeros_like(cls_acc)
        pos_acc[...] = jnp.zeros_like(pos_acc)

    y = cls_t_ref[...]                               # (1, T) int32
    pos = (y > 0).astype(jnp.float32)                # (1, T)
    valid = (y > -1).astype(jnp.float32)             # (1, T)

    # ---- SmoothL1 (beta=1, sum reduction) over positive anchors --------------
    d = loc_p_ref[...].astype(jnp.float32) - loc_t_ref[...].astype(jnp.float32)
    ad = jnp.abs(d)
    sl1 = jnp.where(ad < 1.0, 0.5 * d * d, ad - 0.5)            # (4, T)
    loc_acc[...] += sl1 * pos                                   # broadcast (1,T)

    # ---- Sigmoid focal loss over non-ignored anchors --------------------------
    # Stable form: with t in {0,1}, pt = sigmoid(z), z = x*(2t-1).
    #   log(pt)  = min(z, 0) - log(1 + exp(-|z|))
    #   1 - pt   = sigmoid(-z)
    x = cls_p_ref[...].astype(jnp.float32)                      # (C, T)
    cls_idx = jax.lax.broadcasted_iota(jnp.int32, x.shape, 0) + 1
    t = (y == cls_idx).astype(jnp.float32)                      # (C, T), one_hot[:,1:]
    z = x * (2.0 * t - 1.0)
    e = jnp.exp(-jnp.abs(z))                                    # EUP exp
    inv = 1.0 / (1.0 + e)                                       # EUP recip
    one_m_pt = jnp.where(z >= 0.0, e * inv, inv)                # sigmoid(-z)
    log_pt = jnp.minimum(z, 0.0) - jnp.log(1.0 + e)             # EUP log
    w = ALPHA * t + (1.0 - ALPHA) * (1.0 - t)
    fl = -w * (one_m_pt * one_m_pt) * log_pt                    # (C, T)  (gamma == 2)
    cls_acc[...] += fl * valid

    # ---- positive anchor count ------------------------------------------------
    pos_acc[...] += pos

    @pl.when(step == pl.num_programs(1) - 1)
    def _():
        loss_sum = jnp.sum(loc_acc[...]) + jnp.sum(cls_acc[...])
        pos_sum = jnp.sum(pos_acc[...])
        loss_out_ref[...] = jnp.full(loss_out_ref.shape, loss_sum, jnp.float32)
        pos_out_ref[...] = jnp.full(pos_out_ref.shape, pos_sum, jnp.float32)


@functools.partial(jax.jit,
                   static_argnames=("num_classes", "tile_n", "num_partitions"))
def focal_loss_forward(loc_preds, loc_targets, cls_preds, cls_targets,
                       *, num_classes, tile_n=2048, num_partitions=2):
    B, A, _ = loc_preds.shape
    C = cls_preds.shape[-1]
    assert C == num_classes
    N = B * A

    # Lane-dense layout: anchors on the 128-lane axis (transpose in the wrapper,
    # not in-kernel). Keep native dtypes; the kernel upcasts to f32.
    loc_p = loc_preds.reshape(N, 4).T                    # (4, N)
    loc_t = loc_targets.reshape(N, 4).T                  # (4, N)
    cls_p = cls_preds.reshape(N, C).T                    # (C, N)
    cls_t = cls_targets.reshape(1, N).astype(jnp.int32)  # (1, N)

    # Tiling: each of `num_partitions` cores gets an equal number of `tile`-wide
    # column blocks; pad the anchor axis with ignore labels (-1) as needed.
    P = num_partitions
    tile = _round_up(min(_round_up(tile_n, 128),
                         _round_up(-(-N // P), 128)), 128)
    per_core = _round_up(-(-N // P), tile)
    steps = per_core // tile
    n_pad = P * per_core - N
    if n_pad:
        loc_p = jnp.pad(loc_p, ((0, 0), (0, n_pad)))
        loc_t = jnp.pad(loc_t, ((0, 0), (0, n_pad)))
        cls_p = jnp.pad(cls_p, ((0, 0), (0, n_pad)))
        cls_t = jnp.pad(cls_t, ((0, 0), (0, n_pad)), constant_values=-1)

    n_map = lambda c, i: (0, c * steps + i)

    loss_part, pos_part = pl.pallas_call(
        _focal_loss_kernel,
        out_shape=(jax.ShapeDtypeStruct((P, 8, 128), jnp.float32),
                   jax.ShapeDtypeStruct((P, 8, 128), jnp.float32)),
        grid_spec=pltpu.PrefetchScalarGridSpec(
            num_scalar_prefetch=0,
            grid=(P, steps),
            in_specs=[
                pl.BlockSpec((4, tile), n_map),
                pl.BlockSpec((4, tile), n_map),
                pl.BlockSpec((C, tile), n_map),
                pl.BlockSpec((1, tile), n_map),
            ],
            out_specs=[
                pl.BlockSpec((1, 8, 128), lambda c, i: (c, 0, 0)),
                pl.BlockSpec((1, 8, 128), lambda c, i: (c, 0, 0)),
            ],
            scratch_shapes=[
                pltpu.VMEM((4, tile), jnp.float32),   # SmoothL1 partials
                pltpu.VMEM((C, tile), jnp.float32),   # focal-loss partials
                pltpu.VMEM((1, tile), jnp.float32),   # num_pos partials
            ],
        ),
        compiler_params=pltpu.CompilerParams(
            dimension_semantics=("parallel", "arbitrary")),
    )(loc_p, loc_t, cls_p, cls_t)

    loss_sum = jnp.sum(loss_part[:, 0, 0])
    num_pos = jnp.sum(pos_part[:, 0, 0])
    # Matches the PyTorch reference semantics: divide by num_pos (no guard).
    return loss_sum / num_pos


def _reference_loss(loc_preds, loc_targets, cls_preds, cls_targets, num_classes):
    """Pure-JAX reference mirroring the PyTorch forward semantics."""
    pos = cls_targets > 0
    num_pos = jnp.sum(pos).astype(jnp.float32)

    d = loc_preds - loc_targets
    ad = jnp.abs(d)
    sl1 = jnp.where(ad < 1.0, 0.5 * d * d, ad - 0.5)
    loc_loss = jnp.sum(sl1 * pos[..., None])

    pos_neg = cls_targets > -1
    t = jax.nn.one_hot(cls_targets, num_classes + 1)[..., 1:]
    p = jax.nn.sigmoid(cls_preds)
    pt = p * t + (1.0 - p) * (1.0 - t)
    w = ALPHA * t + (1.0 - ALPHA) * (1.0 - t)
    fl = -w * (1.0 - pt) ** GAMMA * jnp.log(pt)
    cls_loss = jnp.sum(fl * pos_neg[..., None])
    return (loc_loss + cls_loss) / num_pos


if __name__ == "__main__":
    num_classes = 16
    B, A = 2, 256     # batch_size, #anchors  -> N = 512 rows

    key = jax.random.PRNGKey(0)
    k1, k2, k3, k4 = jax.random.split(key, 4)
    loc_preds = jax.random.normal(k1, (B, A, 4), dtype=jnp.float32)
    loc_targets = jax.random.normal(k2, (B, A, 4), dtype=jnp.float32)
    cls_preds = jax.random.normal(k3, (B, A, num_classes), dtype=jnp.float32)
    # labels in [-1, num_classes]: -1 ignore, 0 background, 1..C classes
    cls_targets = jax.random.randint(k4, (B, A), -1, num_classes + 1,
                                     dtype=jnp.int32)

    loss = focal_loss_forward(loc_preds, loc_targets, cls_preds, cls_targets,
                              num_classes=num_classes)
    loss = jax.block_until_ready(loss)

    ref = _reference_loss(loc_preds, loc_targets, cls_preds,
                          cls_targets, num_classes)
    np.testing.assert_allclose(np.asarray(loss), np.asarray(ref),
                               rtol=1e-4, atol=1e-4)
    print("KERNEL_OK")
</pallas_src>

<mosaic_0001>
module attributes {stable_mosaic.version = 11 : i64} {
  func.func @_focal_loss_kernel(%arg0: i32, %arg1: i32, %arg2: memref<4x256xf32, #tpu.memory_space<vmem>>, %arg3: memref<4x256xf32, #tpu.memory_space<vmem>>, %arg4: memref<16x256xf32, #tpu.memory_space<vmem>>, %arg5: memref<1x256xi32, #tpu.memory_space<vmem>>, %arg6: memref<1x8x128xf32, #tpu.memory_space<vmem>>, %arg7: memref<1x8x128xf32, #tpu.memory_space<vmem>>, %arg8: memref<4x256xf32, #tpu.memory_space<vmem>>, %arg9: memref<16x256xf32, #tpu.memory_space<vmem>>, %arg10: memref<1x256xf32, #tpu.memory_space<vmem>>) attributes {dimension_semantics = [#tpu.dimension_semantics<parallel>, #tpu.dimension_semantics<arbitrary>], iteration_bounds = array<i64: 2, 1>, scalar_prefetch = 0 : i64, scratch_operands = 3 : i64, tpu.core_type = #tpu.core_type<tc>, window_params = [{transform_indices = @transform_0, window_bounds = array<i64: 4, 256>}, {transform_indices = @transform_1, window_bounds = array<i64: 4, 256>}, {transform_indices = @transform_2, window_bounds = array<i64: 16, 256>}, {transform_indices = @transform_3, window_bounds = array<i64: 1, 256>}, {transform_indices = @transform_4, window_bounds = array<i64: 1, 8, 128>}, {transform_indices = @transform_5, window_bounds = array<i64: 1, 8, 128>}]} {
    %c0_i32 = arith.constant 0 : i32
    %0 = arith.cmpi eq, %arg1, %c0_i32 : i32
    %1 = arith.extui %0 : i1 to i32
    %c0_i32_0 = arith.constant 0 : i32
    %2 = arith.cmpi ne, %1, %c0_i32_0 : i32
    scf.if %2 {
      %cst_37 = arith.constant 0.000000e+00 : f32
      %83 = vector.broadcast %cst_37 : f32 to vector<4x256xf32>
      %c0_38 = arith.constant 0 : index
      %c0_39 = arith.constant 0 : index
      %84 = vector.load %arg8[%c0_38, %c0_39] : memref<4x256xf32, #tpu.memory_space<vmem>>, vector<4x256xf32>
      tpu.vector_store %arg8[%c0_38, %c0_39], %83 {strides = array<i32>} : memref<4x256xf32, #tpu.memory_space<vmem>>, vector<4x256xf32>,
      %cst_40 = arith.constant 0.000000e+00 : f32
      %85 = vector.broadcast %cst_40 : f32 to vector<16x256xf32>
      %c0_41 = arith.constant 0 : index
      %c0_42 = arith.constant 0 : index
      %86 = vector.load %arg9[%c0_41, %c0_42] : memref<16x256xf32, #tpu.memory_space<vmem>>, vector<16x256xf32>
      tpu.vector_store %arg9[%c0_41, %c0_42], %85 {strides = array<i32>} : memref<16x256xf32, #tpu.memory_space<vmem>>, vector<16x256xf32>,
      %cst_43 = arith.constant 0.000000e+00 : f32
      %87 = vector.broadcast %cst_43 : f32 to vector<1x256xf32>
      %c0_44 = arith.constant 0 : index
      %c0_45 = arith.constant 0 : index
      %88 = vector.load %arg10[%c0_44, %c0_45] : memref<1x256xf32, #tpu.memory_space<vmem>>, vector<1x256xf32>
      tpu.vector_store %arg10[%c0_44, %c0_45], %87 {strides = array<i32>} : memref<1x256xf32, #tpu.memory_space<vmem>>, vector<1x256xf32>,
    } else {
    }
    %c0 = arith.constant 0 : index
    %c0_1 = arith.constant 0 : index
    %3 = vector.load %arg5[%c0, %c0_1] : memref<1x256xi32, #tpu.memory_space<vmem>>, vector<1x256xi32>
    %c0_i32_2 = arith.constant 0 : i32
    %4 = vector.broadcast %c0_i32_2 : i32 to vector<1x256xi32>
    %5 = arith.cmpi sgt, %3, %4 : vector<1x256xi32>
    %6 = arith.extui %5 : vector<1x256xi1> to vector<1x256xi32>
    %7 = arith.sitofp %6 : vector<1x256xi32> to vector<1x256xf32>
    %c-1_i32 = arith.constant -1 : i32
    %8 = vector.broadcast %c-1_i32 : i32 to vector<1x256xi32>
    %9 = arith.cmpi sgt, %3, %8 : vector<1x256xi32>
    %10 = arith.extui %9 : vector<1x256xi1> to vector<1x256xi32>
    %11 = arith.sitofp %10 : vector<1x256xi32> to vector<1x256xf32>
    %c0_3 = arith.constant 0 : index
    %c0_4 = arith.constant 0 : index
    %12 = vector.load %arg2[%c0_3, %c0_4] : memref<4x256xf32, #tpu.memory_space<vmem>>, vector<4x256xf32>
    %c0_5 = arith.constant 0 : index
    %c0_6 = arith.constant 0 : index
    %13 = vector.load %arg3[%c0_5, %c0_6] : memref<4x256xf32, #tpu.memory_space<vmem>>, vector<4x256xf32>
    %14 = arith.subf %12, %13 : vector<4x256xf32>
    %15 = math.absf %14 : vector<4x256xf32>
    %cst = arith.constant 1.000000e+00 : f32
    %16 = vector.broadcast %cst : f32 to vector<4x256xf32>
    %17 = arith.cmpf olt, %15, %16 : vector<4x256xf32>
    %cst_7 = arith.constant 5.000000e-01 : f32
    %18 = vector.broadcast %cst_7 : f32 to vector<4x256xf32>
    %19 = arith.mulf %18, %14 : vector<4x256xf32>
    %20 = arith.mulf %19, %14 : vector<4x256xf32>
    %cst_8 = arith.constant 5.000000e-01 : f32
    %21 = vector.broadcast %cst_8 : f32 to vector<4x256xf32>
    %22 = arith.subf %15, %21 : vector<4x256xf32>
    %23 = arith.select %17, %20, %22 : vector<4x256xi1>, vector<4x256xf32>
    %c0_9 = arith.constant 0 : index
    %c0_10 = arith.constant 0 : index
    %24 = vector.load %arg8[%c0_9, %c0_10] : memref<4x256xf32, #tpu.memory_space<vmem>>, vector<4x256xf32>
    %25 = vector.broadcast %7 : vector<1x256xf32> to vector<4x256xf32>
    %26 = arith.mulf %23, %25 : vector<4x256xf32>
    %27 = arith.addf %24, %26 : vector<4x256xf32>
    %c0_11 = arith.constant 0 : index
    %c0_12 = arith.constant 0 : index
    %28 = vector.load %arg8[%c0_11, %c0_12] : memref<4x256xf32, #tpu.memory_space<vmem>>, vector<4x256xf32>
    tpu.vector_store %arg8[%c0_11, %c0_12], %27 {strides = array<i32>} : memref<4x256xf32, #tpu.memory_space<vmem>>, vector<4x256xf32>,
    %c0_13 = arith.constant 0 : index
    %c0_14 = arith.constant 0 : index
    %29 = vector.load %arg4[%c0_13, %c0_14] : memref<16x256xf32, #tpu.memory_space<vmem>>, vector<16x256xf32>
    %30 = tpu.iota {dimensions = array<i32: 0>} : vector<16x256xi32>
    %c1_i32 = arith.constant 1 : i32
    %31 = vector.broadcast %c1_i32 : i32 to vector<16x256xi32>
    %32 = arith.addi %30, %31 : vector<16x256xi32>
    %33 = vector.broadcast %3 : vector<1x256xi32> to vector<16x256xi32>
    %34 = arith.cmpi eq, %33, %32 : vector<16x256xi32>
    %35 = arith.extui %34 : vector<16x256xi1> to vector<16x256xi32>
    %36 = arith.sitofp %35 : vector<16x256xi32> to vector<16x256xf32>
    %cst_15 = arith.constant 2.000000e+00 : f32
    %37 = vector.broadcast %cst_15 : f32 to vector<16x256xf32>
    %38 = arith.mulf %37, %36 : vector<16x256xf32>
    %cst_16 = arith.constant 1.000000e+00 : f32
    %39 = vector.broadcast %cst_16 : f32 to vector<16x256xf32>
    %40 = arith.subf %38, %39 : vector<16x256xf32>
    %41 = arith.mulf %29, %40 : vector<16x256xf32>
    %42 = math.absf %41 : vector<16x256xf32>
    %cst_17 = arith.constant 0.000000e+00 : f32
    %43 = vector.broadcast %cst_17 : f32 to vector<16x256xf32>
    %44 = arith.subf %43, %42 : vector<16x256xf32>
    %45 = math.exp %44 : vector<16x256xf32>
    %cst_18 = arith.constant 1.000000e+00 : f32
    %46 = vector.broadcast %cst_18 : f32 to vector<16x256xf32>
    %47 = arith.addf %46, %45 : vector<16x256xf32>
    %cst_19 = arith.constant 1.000000e+00 : f32
    %48 = vector.broadcast %cst_19 : f32 to vector<16x256xf32>
    %49 = arith.divf %48, %47 : vector<16x256xf32>
    %cst_20 = arith.constant 0.000000e+00 : f32
    %50 = vector.broadcast %cst_20 : f32 to vector<16x256xf32>
    %51 = arith.cmpf oge, %41, %50 : vector<16x256xf32>
    %52 = arith.mulf %45, %49 : vector<16x256xf32>
    %53 = arith.select %51, %52, %49 : vector<16x256xi1>, vector<16x256xf32>
    %cst_21 = arith.constant 0.000000e+00 : f32
    %54 = vector.broadcast %cst_21 : f32 to vector<16x256xf32>
    %55 = arith.minimumf %41, %54 : vector<16x256xf32>
    %cst_22 = arith.constant 1.000000e+00 : f32
    %56 = vector.broadcast %cst_22 : f32 to vector<16x256xf32>
    %57 = arith.addf %56, %45 : vector<16x256xf32>
    %58 = math.log %57 : vector<16x256xf32>
    %59 = arith.subf %55, %58 : vector<16x256xf32>
    %cst_23 = arith.constant 2.500000e-01 : f32
    %60 = vector.broadcast %cst_23 : f32 to vector<16x256xf32>
    %61 = arith.mulf %60, %36 : vector<16x256xf32>
    %cst_24 = arith.constant 1.000000e+00 : f32
    %62 = vector.broadcast %cst_24 : f32 to vector<16x256xf32>
    %63 = arith.subf %62, %36 : vector<16x256xf32>
    %cst_25 = arith.constant 7.500000e-01 : f32
    %64 = vector.broadcast %cst_25 : f32 to vector<16x256xf32>
    %65 = arith.mulf %64, %63 : vector<16x256xf32>
    %66 = arith.addf %61, %65 : vector<16x256xf32>
    %cst_26 = arith.constant 0.000000e+00 : f32
    %67 = vector.broadcast %cst_26 : f32 to vector<16x256xf32>
    %68 = arith.subf %67, %66 : vector<16x256xf32>
    %69 = arith.mulf %53, %53 : vector<16x256xf32>
    %70 = arith.mulf %68, %69 : vector<16x256xf32>
    %71 = arith.mulf %70, %59 : vector<16x256xf32>
    %c0_27 = arith.constant 0 : index
    %c0_28 = arith.constant 0 : index
    %72 = vector.load %arg9[%c0_27, %c0_28] : memref<16x256xf32, #tpu.memory_space<vmem>>, vector<16x256xf32>
    %73 = vector.broadcast %11 : vector<1x256xf32> to vector<16x256xf32>
    %74 = arith.mulf %71, %73 : vector<16x256xf32>
    %75 = arith.addf %72, %74 : vector<16x256xf32>
    %c0_29 = arith.constant 0 : index
    %c0_30 = arith.constant 0 : index
    %76 = vector.load %arg9[%c0_29, %c0_30] : memref<16x256xf32, #tpu.memory_space<vmem>>, vector<16x256xf32>
    tpu.vector_store %arg9[%c0_29, %c0_30], %75 {strides = array<i32>} : memref<16x256xf32, #tpu.memory_space<vmem>>, vector<16x256xf32>,
    %c0_31 = arith.constant 0 : index
    %c0_32 = arith.constant 0 : index
    %77 = vector.load %arg10[%c0_31, %c0_32] : memref<1x256xf32, #tpu.memory_space<vmem>>, vector<1x256xf32>
    %78 = arith.addf %77, %7 : vector<1x256xf32>
    %c0_33 = arith.constant 0 : index
    %c0_34 = arith.constant 0 : index
    %79 = vector.load %arg10[%c0_33, %c0_34] : memref<1x256xf32, #tpu.memory_space<vmem>>, vector<1x256xf32>
    tpu.vector_store %arg10[%c0_33, %c0_34], %78 {strides = array<i32>} : memref<1x256xf32, #tpu.memory_space<vmem>>, vector<1x256xf32>,
    %c0_i32_35 = arith.constant 0 : i32
    %80 = arith.cmpi eq, %arg1, %c0_i32_35 : i32
    %81 = arith.extui %80 : i1 to i32
    %c0_i32_36 = arith.constant 0 : i32
    %82 = arith.cmpi ne, %81, %c0_i32_36 : i32
    scf.if %82 {
      %c0_37 = arith.constant 0 : index
      %c0_38 = arith.constant 0 : index
      %83 = vector.load %arg8[%c0_37, %c0_38] : memref<4x256xf32, #tpu.memory_space<vmem>>, vector<4x256xf32>
      %84 = vector.shape_cast %83 : vector<4x256xf32> to vector<1x4x256xf32>
      %cst_39 = arith.constant dense<0.000000e+00> : vector<1xf32>
      %85 = vector.multi_reduction <add>, %84, %cst_39 [1, 2] : vector<1x4x256xf32> to vector<1xf32>
      %86 = vector.shape_cast %85 : vector<1xf32> to vector<1x1x1xf32>
      %87 = vector.extract %86[0, 0, 0] : f32 from vector<1x1x1xf32>
      %c0_40 = arith.constant 0 : index
      %c0_41 = arith.constant 0 : index
      %88 = vector.load %arg9[%c0_40, %c0_41] : memref<16x256xf32, #tpu.memory_space<vmem>>, vector<16x256xf32>
      %89 = vector.shape_cast %88 : vector<16x256xf32> to vector<1x16x256xf32>
      %cst_42 = arith.constant dense<0.000000e+00> : vector<1xf32>
      %90 = vector.multi_reduction <add>, %89, %cst_42 [1, 2] : vector<1x16x256xf32> to vector<1xf32>
      %91 = vector.shape_cast %90 : vector<1xf32> to vector<1x1x1xf32>
      %92 = vector.extract %91[0, 0, 0] : f32 from vector<1x1x1xf32>
      %93 = arith.addf %87, %92 : f32
      %c0_43 = arith.constant 0 : index
      %c0_44 = arith.constant 0 : index
      %94 = vector.load %arg10[%c0_43, %c0_44] : memref<1x256xf32, #tpu.memory_space<vmem>>, vector<1x256xf32>
      %95 = vector.shape_cast %94 : vector<1x256xf32> to vector<1x1x256xf32>
      %cst_45 = arith.constant dense<0.000000e+00> : vector<1xf32>
      %96 = vector.multi_reduction <add>, %95, %cst_45 [1, 2] : vector<1x1x256xf32> to vector<1xf32>
      %97 = vector.shape_cast %96 : vector<1xf32> to vector<1x1x1xf32>
      %98 = vector.extract %97[0, 0, 0] : f32 from vector<1x1x1xf32>
      %99 = vector.broadcast %93 : f32 to vector<1x8x128xf32>
      %c0_46 = arith.constant 0 : index
      %c0_47 = arith.constant 0 : index
      %c0_48 = arith.constant 0 : index
      %100 = vector.load %arg6[%c0_46, %c0_47, %c0_48] : memref<1x8x128xf32, #tpu.memory_space<vmem>>, vector<1x8x128xf32>
      tpu.vector_store %arg6[%c0_46, %c0_47, %c0_48], %99 {strides = array<i32>} : memref<1x8x128xf32, #tpu.memory_space<vmem>>, vector<1x8x128xf32>,
      %101 = vector.broadcast %98 : f32 to vector<1x8x128xf32>
      %c0_49 = arith.constant 0 : index
      %c0_50 = arith.constant 0 : index
      %c0_51 = arith.constant 0 : index
      %102 = vector.load %arg7[%c0_49, %c0_50, %c0_51] : memref<1x8x128xf32, #tpu.memory_space<vmem>>, vector<1x8x128xf32>
      tpu.vector_store %arg7[%c0_49, %c0_50, %c0_51], %101 {strides = array<i32>} : memref<1x8x128xf32, #tpu.memory_space<vmem>>, vector<1x8x128xf32>,
    } else {
    }
    return
  }
  func.func @transform_0(%arg0: i32, %arg1: i32) -> (i32, i32) {
    %c1_i32 = arith.constant 1 : i32
    %0 = arith.muli %arg0, %c1_i32 : i32
    %1 = arith.addi %0, %arg1 : i32
    %c0_i32 = arith.constant 0 : i32
    %c0_i32_0 = arith.constant 0 : i32
    return %c0_i32, %1 : i32, i32
  }
  func.func @transform_1(%arg0: i32, %arg1: i32) -> (i32, i32) {
    %c1_i32 = arith.constant 1 : i32
    %0 = arith.muli %arg0, %c1_i32 : i32
    %1 = arith.addi %0, %arg1 : i32
    %c0_i32 = arith.constant 0 : i32
    %c0_i32_0 = arith.constant 0 : i32
    return %c0_i32, %1 : i32, i32
  }
  func.func @transform_2(%arg0: i32, %arg1: i32) -> (i32, i32) {
    %c1_i32 = arith.constant 1 : i32
    %0 = arith.muli %arg0, %c1_i32 : i32
    %1 = arith.addi %0, %arg1 : i32
    %c0_i32 = arith.constant 0 : i32
    %c0_i32_0 = arith.constant 0 : i32
    return %c0_i32, %1 : i32, i32
  }
  func.func @transform_3(%arg0: i32, %arg1: i32) -> (i32, i32) {
    %c1_i32 = arith.constant 1 : i32
    %0 = arith.muli %arg0, %c1_i32 : i32
    %1 = arith.addi %0, %arg1 : i32
    %c0_i32 = arith.constant 0 : i32
    %c0_i32_0 = arith.constant 0 : i32
    return %c0_i32, %1 : i32, i32
  }
  func.func @transform_4(%arg0: i32, %arg1: i32) -> (i32, i32, i32) {
    %c0_i32 = arith.constant 0 : i32
    %c0_i32_0 = arith.constant 0 : i32
    %c0_i32_1 = arith.constant 0 : i32
    return %arg0, %c0_i32, %c0_i32_0 : i32, i32, i32
  }
  func.func @transform_5(%arg0: i32, %arg1: i32) -> (i32, i32, i32) {
    %c0_i32 = arith.constant 0 : i32
    %c0_i32_0 = arith.constant 0 : i32
    %c0_i32_1 = arith.constant 0 : i32
    return %arg0, %c0_i32, %c0_i32_0 : i32, i32, i32
  }
}

</mosaic_0001>

<bundles_post_ra>
// kernel: focal_loss_forward.1
= control target key start
LH: loop header
LB: loop body
LE: loop exit
PB: predicated region body
PF: predicated region fallthrough
CT: control target
= control target key end

     0   :  { %s939_s18 = smov 0   ;;  %s941_s19 = smov 0   ;;  %s1101_s0 = inlined_call_operand.vmem [shape: f32[4,512], index: 0, kind: input, shape index: {}]   ;;  %s1102_s1 = inlined_call_operand.vmem [shape: f32[4,512], index: 1, kind: input, shape index: {}]   ;;  %s1103_s2 = inlined_call_operand.vmem [shape: f32[16,512], index: 2, kind: input, shape index: {}]   ;;  %s1104_s3 = inlined_call_operand.vmem [shape: s32[1,512], index: 3, kind: input, shape index: {}]   ;;  %s1105_s4 = inlined_call_operand.vmem [shape: f32[2,8,128], index: 4, kind: output, shape index: {0}]   ;;  %s1106_s5 = inlined_call_operand.vmem [shape: f32[2,8,128], index: 5, kind: output, shape index: {1}]  }
   0x1   :  { %s943_s20 = smov 0   ;;  %s945_s21 = smov 0  }
   0x2   :  { %s947_s22 = smov 0  }
   0x3 LB: > { %s28_s23 = sadd.s32 1, %s902_s21  ;;  %p100_p1 = scmp.ne.s32.totalorder %s894_s19, %s890_s18  ;;  %s906_s22 = sphi %s947_s22, %s16_s22   ;;  %s902_s21 = sphi %s945_s21, %s1112_s21   ;;  %s898_s20 = sphi %s943_s20, %s1111_s20   ;;  %s894_s19 = sphi %s941_s19, %s1110_s19   ;;  %s890_s18 = sphi %s939_s18, %s1109_s18  }
   0x4   : > { %p30_p0 = scmp.ge.s32.totalorder %s28_s23, 2  ;;  %p101_p2 = scmp.eq.s32.totalorder %s906_s22, 0 }
   0x5   : > { %s93_s25 = sadd.s32 1, %s894_s19  ;;  %p770_p5 = scmp.ge.s32.totalorder %s906_s22, 2 }
   0x6   : > { %s1114_s23 = smov (%p30_p0, %s28_s23), 0  ;;  %p102_p3 = por %p101_p2, %p100_p1 }
   0x7   : > { %s90_s24 = ssub.s32 %s902_s21, %s1114_s23  ;;  %206 = sbr.rel (%p770_p5) target bundleno = 18 (0x12), region = 16 }
   0x8   : > { %p91_p4 = scmp.eq.s32.totalorder %s90_s24, 0 }
   0xa   : > { %s974_s26 = scalar_select %p91_p4, %s894_s19, %s93_s25  }
   0xc   : > { %231 = sbr.rel (!%p102_p3) target bundleno = 18 (0x12), region = 28  ;;  %s233_s27 = sand.u32 (%p102_p3), 1, %s894_s19  }
   0xd   : > { %s796_s28 = sshll.u32 (%p102_p3), %s902_s21, 4  ;;  %s771_s29 = sshll.u32 (%p102_p3), %s233_s27, 5 }
   0xe   : > { %s239_s7 = scalar_lea.vmem (%p102_p3), %s1103_s2, %s796_s28  ;;  %s235_s8 = scalar_lea.vmem (%p102_p3), [#allocation5], %s771_s29 }
   0xf   : > { %v252_v0 = vld [vmem:[%s239_s7] sm:$0xff] (%p102_p3)  ;;  %v254_v1 = vld [vmem:[%s239_s7 + $0x8] sm:$0xff] (%p102_p3) }
  0x10   : > { %v256_v2 = vld [vmem:[%s239_s7 + $0x20] sm:$0xff] (%p102_p3)  ;;  %253 = vst [vmem:[%s235_s8] sm:$0xff] (%p102_p3), %v252_v0  ;;  %255 = vst [vmem:[%s235_s8 + $0x8] sm:$0xff] (%p102_p3), %v254_v1  ;;  %v258_v3 = vld [vmem:[%s239_s7 + $0x28] sm:$0xff] (%p102_p3) }
  0x11   : > { %257 = vst [vmem:[%s235_s8 + $0x10] sm:$0xff] %v256_v2  ;;  %259 = vst [vmem:[%s235_s8 + $0x18] sm:$0xff] %v258_v3 }
  0x12 PF: > { %p774_p6 = scmp.ge.s32.totalorder %s906_s22, 1  ;;  %p274_p7 = scmp.lt.s32.totalorder %s906_s22, 3 }
  0x14   : > { %p275_p8 = pnand %p774_p6, %p274_p7 }
  0x15   : > { %s776_s9 = sshll.u32 (!%p275_p8), %s898_s20, 1  ;;  %s281_s10 = sand.u32 (!%p275_p8), 1, %s890_s18  }
  0x16   : > { %278 = sbr.rel (%p275_p8) target bundleno = 303 (0x12f), region = 55  ;;  %p330_p9 = scmp.lt.s32.totalorder (!%p275_p8), %s776_s9, 3 }
  0x17   : > { %s775_s18 = sshll.u32 (!%p275_p8), %s281_s10, 5  ;;  %p353_p10 = scmp.lt.s32.totalorder (!%p275_p8), %s898_s20, 1 }
  0x18   : > { %s283_s28 = scalar_lea.vmem (!%p275_p8), [#allocation5], %s775_s18 }
  0x1b   : > { %v370_v4 = vlaneseq  ;;  %s1116_s9 = smov (!%p330_p9, %s776_s9), 3  ;;  %v908_v7 = vmov 0.0   ;;  %vm576_vm7 = vcmask 1043456   ;;  %v406_v37 = vld [vmem:[%s283_s28] sm:$0xff]  ;;  %v407_v38 = vld [vmem:[%s283_s28 + $0x8] sm:$0xff]  ;;  %v408_v41 = vld [vmem:[%s283_s28 + $0x10] sm:$0xff] }
  0x1c   : > { %s777_s11 = sshll.u32 %s1116_s9, 2  ;;  %s350_s14 = scalar_lea.vmem %s1104_s3, %s1116_s9  ;;  %v409_v42 = vld [vmem:[%s283_s28 + $0x18] sm:$0xff]  ;;  %vm618_vm8 = vcmask 1040384  }
  0x1d   : > { %vm985_vm0 = vcmp.lt.s32.totalorder %v370_v4, 256  ;;  %v394_v6 = vshrl.u32 %v370_v4, 7  ;;  %s333_s17 = scalar_lea.vmem %s1101_s0, %s777_s11  ;;  %s341_s27 = scalar_lea.vmem %s1102_s1, %s777_s11  ;;  %v1006_v12 = vld [vmem:[%s350_s14] sm:$0x3] }
  0x1e   : > { %374 = vst.msk [vmem:[#allocation4] sm:$0x3] %vm985_vm0, %v908_v7  ;;  %vm376_vm1 = vcmp.gt.s32.totalorder %v1006_v12, 0  ;;  %v382_v14 = vld [vmem:[%s333_s17] sm:$0xff]  ;;  %vm379_vm9 = vcmp.gt.s32.totalorder %v1006_v12, 4294967295  ;;  %s1118_s20 = smov (!%p353_p10, %s898_s20), 1 }
  0x1f   : > { %v992_v8 = vsub.s32 0, %v394_v6  ;;  %v994_v9 = vsub.s32 1, %v394_v6  ;;  %v412_v10 = vadd.s32 8, %v394_v6  ;;  %v413_v11 = vadd.s32 1, %v394_v6  ;;  %v383_v15 = vld [vmem:[%s341_s27] sm:$0xff]  ;;  %s781_s29 = sshll.u32 %s1118_s20, 3 }
  0x20   : > { %v783_v18 = vsel %vm376_vm1, 1.0, %v908_v7  ;;  %v384_v19 = vsub.f32 %v382_v14, %v383_v15  ;;  %s356_s8 = scalar_lea.vmem %s1105_s4, %s781_s29  ;;  %s360_s12 = scalar_lea.vmem %s1106_s5, %s781_s29 }
  0x21   : > { %v414_v13 = vadd.s32 1, %v412_v10  ;;  %v418_v16 = vrot.slane %v1006_v12, %v992_v8  ;;  %v422_v17 = vrot.slane %v1006_v12, %v994_v9  ;;  %v396_v20 = vrot.slane %v783_v18, %v992_v8 }
  0x22   : > { %v400_v21 = vrot.slane %v783_v18, %v994_v9  ;;  %v385_v22 = vand.u32 2147483647, %v384_v19  ;;  %v387_v23 = vmul.f32 0.5, %v384_v19 }
  0x23   : > { %vm423_vm2 = vcmp.eq.s32.totalorder %v418_v16, %v413_v11  ;;  %vm424_vm3 = vcmp.eq.s32.totalorder %v422_v17, %v413_v11  ;;  %vm425_vm4 = vcmp.eq.s32.totalorder %v418_v16, %v414_v13  ;;  %vm426_vm5 = vcmp.eq.s32.totalorder %v422_v17, %v414_v13 }
  0x24   : > { %v401_v25 = vcombine.low %v396_v20, %v400_v21  ;;  %v1017_v27 = vsel %vm423_vm2, 1.0, %v908_v7  ;;  %v1020_v28 = vsel %vm424_vm3, 1.0, %v908_v7  ;;  %vm386_vm6 = vcmp.lt.f32.partialorder %v385_v22, 1.0 }
  0x25   : > { %v562_v24 = vld [vmem:[#allocation4] sm:$0x3]  ;;  %v388_v29 = vmul.f32 %v387_v23, %v384_v19  ;;  %v785_v30 = vadd.f32 -0.5, %v385_v22  ;;  %v1023_v31 = vsel %vm425_vm4, 1.0, %v908_v7  ;;  %v1028_v32 = vsel %vm426_vm5, 1.0, %v908_v7 }
  0x26   : > { %v563_v26 = vadd.f32 %v783_v18, %v562_v24  ;;  %v435_v33 = vmul.f32 2.0, %v1017_v27  ;;  %v436_v34 = vmul.f32 2.0, %v1020_v28  ;;  %v437_v35 = vmul.f32 2.0, %v1023_v31 }
  0x27   : > { %v390_v36 = vsel %vm386_vm6, %v388_v29, %v785_v30  ;;  %v438_v39 = vmul.f32 2.0, %v1028_v32  ;;  %v507_v21 = vsub.f32 1.0, %v1017_v27  ;;  %v508_v22 = vsub.f32 1.0, %v1020_v28 }
  0x28   : > { %568 = vst.msk [vmem:[#allocation4] sm:$0x3] %vm985_vm0, %v563_v26  ;;  %v403_v40 = vmul.f32 %v401_v25, %v390_v36  ;;  %v790_v43 = vadd.f32 -1.0, %v435_v33  ;;  %v791_v44 = vadd.f32 -1.0, %v436_v34  ;;  %v792_v45 = vadd.f32 -1.0, %v437_v35 }
  0x29   : > { %v793_v46 = vadd.f32 -1.0, %v438_v39  ;;  %v509_v23 = vsub.f32 1.0, %v1023_v31  ;;  %v510_v24 = vsub.f32 1.0, %v1028_v32  ;;  %v503_v25 = vmul.f32 0.25, %v1017_v27 }
  0x2a   : > { %v574_v47 = vcombine.high %v403_v40, %v403_v40  ;;  %v577_v48 = vsel %vm576_vm7, %v403_v40, 0.0  ;;  %v1035_v49 = vmul.f32 %v790_v43, %v406_v37  ;;  %v1037_v50 = vmul.f32 %v791_v44, %v407_v38 }
  0x2b   : > { %v1039_v51 = vmul.f32 %v792_v45, %v408_v41  ;;  %v1041_v52 = vmul.f32 %v793_v46, %v409_v42  ;;  %v511_v26 = vmul.f32 0.75, %v507_v21  ;;  %v504_v29 = vmul.f32 0.25, %v1020_v28 }
  0x2c   : > { %v578_v53 = vsel %vm576_vm7, %v574_v47, 0.0  ;;  %v447_v54 = vand.u32 2147483647, %v1035_v49  ;;  %v448_v55 = vand.u32 2147483647, %v1037_v50  ;;  %v512_v30 = vmul.f32 0.75, %v508_v22 }
  0x2d   : > { %v579_v56 = vadd.f32 %v578_v53, %v577_v48  ;;  %v449_v58 = vand.u32 2147483647, %v1039_v51  ;;  %v450_v59 = vand.u32 2147483647, %v1041_v52  ;;  %v505_v33 = vmul.f32 0.25, %v1023_v31 }
  0x2e   : > { %v451_v62 = vsub.f32 0.0, %v447_v54  ;;  %v452_v63 = vsub.f32 0.0, %v448_v55  ;;  %v513_v34 = vmul.f32 0.75, %v509_v23  ;;  %v784_v35 = vsel %vm379_vm9, 1.0, %v908_v7 }
  0x2f   : > { %v606_v57 = vld [vmem:[#allocation4] sm:$0x3]  ;;  %580 = vadd.xlane.f32.xlu0 %v579_v56  ;;  %v453_v0 = vsub.f32 0.0, %v449_v58  ;;  %v454_v1 = vsub.f32 0.0, %v450_v59  ;;  %v506_v36 = vmul.f32 0.25, %v1028_v32  ;;  %v514_v37 = vmul.f32 0.75, %v510_v24 }
  0x30   : > { %v611_v60 = vrot.slane %v606_v57, %v992_v8  ;;  %v615_v61 = vrot.slane %v606_v57, %v994_v9  ;;  %v455_v4 = vmul.f32 1.442695, %v451_v62  ;;  %v457_v5 = vmul.f32 1.442695, %v452_v63 }
  0x31   : > { %v459_v10 = vmul.f32 1.442695, %v453_v0  ;;  %v461_v11 = vmul.f32 1.442695, %v454_v1  ;;  %v515_v38 = vadd.f32 %v511_v26, %v503_v25  ;;  %vm475_vm10 = vcmp.ge.f32.partialorder %v1035_v49, 0.0 }
  0x32   : > { %v619_v2 = vsel %vm618_vm8, %v611_v60, 0.0  ;;  %v620_v3 = vsel %vm618_vm8, %v615_v61, 0.0  ;;  %844 = vpow2.f32 %v455_v4  ;;  %v516_v39 = vadd.f32 %v512_v30, %v504_v29 }
  0x33   : > { %v621_v6 = vadd.f32 %v620_v3, %v619_v2  ;;  %846 = vpow2.f32 %v457_v5  ;;  %vm476_vm11 = vcmp.ge.f32.partialorder %v1037_v50, 0.0  ;;  %vm477_vm12 = vcmp.ge.f32.partialorder %v1039_v51, 0.0 }
  0x34   : > { %848 = vpow2.f32 %v459_v10  ;;  %v517_v27 = vadd.f32 %v513_v34, %v505_v33  ;;  %v543_v28 = vrot.slane %v784_v35, %v992_v8  ;;  %vm478_vm13 = vcmp.ge.f32.partialorder %v1041_v52, 0.0 }
  0x35   : > { %622 = vadd.xlane.f32.xlu1 %v621_v6  ;;  %850 = vpow2.f32 %v461_v11  ;;  %v487_v7 = vmin.f32 %v1035_v49, 0.0  ;;  %v518_v32 = vadd.f32 %v514_v37, %v506_v36  ;;  %v488_v43 = vmin.f32 %v1037_v50, 0.0 }
  0x36   : > { %v489_v44 = vmin.f32 %v1039_v51, 0.0  ;;  %v519_v45 = vsub.f32 0.0, %v515_v38  ;;  %v490_v8 = vmin.f32 %v1041_v52, 0.0  ;;  %v520_v53 = vsub.f32 0.0, %v516_v39 }
  0x37   : > { %v521_v57 = vsub.f32 0.0, %v517_v27  ;;  %v522_v62 = vsub.f32 0.0, %v518_v32  ;;  %v547_v51 = vrot.slane %v784_v35, %v994_v9 }
  0x3f   : > { %v845_v13 = vpop.eup %844 }
  0x40   : > { %v847_v14 = vpop.eup %846  ;;  %v463_v15 = vadd.f32 1.0, %v845_v13 }
  0x41   : > { %v849_v16 = vpop.eup %848  ;;  %v464_v17 = vadd.f32 1.0, %v847_v14 }
  0x42   : > { %v851_v18 = vpop.eup %850  ;;  %v465_v19 = vadd.f32 1.0, %v849_v16  ;;  %852 = vrcp.f32 %v463_v15 }
  0x43   : > { %v466_v20 = vadd.f32 1.0, %v851_v18  ;;  %854 = vrcp.f32 %v464_v17 }
  0x44   : > { %856 = vrcp.f32 %v465_v19 }
  0x45   : > { %858 = vrcp.f32 %v466_v20 }
  0x46   : > { %860 = vlog2.f32 %v463_v15 }
  0x47   : > { %862 = vlog2.f32 %v464_v17 }
  0x48   : > { %864 = vlog2.f32 %v465_v19 }
  0x49   : > { %866 = vlog2.f32 %v466_v20 }
  0x4f   : > { %v853_v12 = vpop.eup %852 }
  0x50   : > { %v855_v40 = vpop.eup %854  ;;  %v479_v31 = vmul.f32 %v853_v12, %v845_v13 }
  0x51   : > { %v857_v41 = vpop.eup %856  ;;  %v480_v42 = vmul.f32 %v855_v40, %v847_v14 }
  0x52   : > { %v859_v46 = vpop.eup %858  ;;  %v481_v47 = vmul.f32 %v857_v41, %v849_v16  ;;  %v483_v48 = vsel %vm475_vm10, %v479_v31, %v853_v12 }
  0x53   : > { %v861_v54 = vpop.eup %860  ;;  %v482_v55 = vmul.f32 %v859_v46, %v851_v18  ;;  %v484_v56 = vsel %vm476_vm11, %v480_v42, %v855_v40  ;;  %v523_v58 = vmul.f32 %v483_v48, %v483_v48 }
  0x54   : > { %v863_v59 = vpop.eup %862  ;;  %v485_v60 = vsel %vm477_vm12, %v481_v47, %v857_v41  ;;  %v492_v61 = vmul.f32 0.6931472, %v861_v54  ;;  %v524_v63 = vmul.f32 %v484_v56, %v484_v56 }
  0x55   : > { %v865_v0 = vpop.eup %864  ;;  %v486_v49 = vsel %vm478_vm13, %v482_v55, %v859_v46  ;;  %v494_v1 = vmul.f32 0.6931472, %v863_v59  ;;  %v525_v2 = vmul.f32 %v485_v60, %v485_v60  ;;  %v527_v3 = vmul.f32 %v523_v58, %v519_v45 }
  0x56   : > { %v867_v4 = vpop.eup %866  ;;  %v496_v5 = vmul.f32 0.6931472, %v865_v0  ;;  %v499_v50 = vsub.f32 %v487_v7, %v492_v61  ;;  %v526_v6 = vmul.f32 %v486_v49, %v486_v49  ;;  %v528_v10 = vmul.f32 %v524_v63, %v520_v53 }
  0x57   : > { %v498_v11 = vmul.f32 0.6931472, %v867_v4  ;;  %v500_v13 = vsub.f32 %v488_v43, %v494_v1  ;;  %v529_v14 = vmul.f32 %v525_v2, %v521_v57 }
  0x58   : > { %v501_v15 = vsub.f32 %v489_v44, %v496_v5  ;;  %v530_v16 = vmul.f32 %v526_v6, %v522_v62  ;;  %v531_v17 = vmul.f32 %v527_v3, %v499_v50 }
  0x59   : > { %v502_v18 = vsub.f32 %v490_v8, %v498_v11  ;;  %v532_v19 = vmul.f32 %v528_v10, %v500_v13 }
  0x5a   : > { %v533_v52 = vmul.f32 %v529_v14, %v501_v15  ;;  %v550_v20 = vmul.f32 %v543_v28, %v531_v17 }
  0x5b   : > { %v534_v21 = vmul.f32 %v530_v16, %v502_v18  ;;  %v551_v22 = vmul.f32 %v547_v51, %v532_v19 }
  0x5c   : > { %v552_v23 = vmul.f32 %v543_v28, %v533_v52 }
  0x5d   : > { %v553_v24 = vmul.f32 %v547_v51, %v534_v21  ;;  %v593_v25 = vadd.f32 %v551_v22, %v550_v20 }
  0x5f   : > { %v594_v26 = vadd.f32 %v593_v25, %v552_v23 }
  0x61   : > { %v595_v29 = vadd.f32 %v594_v26, %v553_v24 }
  0x63   : > { %596 = vadd.xlane.f32.xlu0 %v595_v29 }
  0xb8   : > { %v581_v30 = vpop.xlane.xlu0 %580 }
  0xb9   : > { %v582_v33 = vrot.slane %v581_v30, 4 }
  0xbb   : > { %v583_v34 = vadd.f32 %v582_v33, %v581_v30 }
  0xbd   : > { %v584_v36 = vrot.slane %v583_v34, 2 }
  0xbe   : > { %v623_v38 = vpop.xlane.xlu1 %622 }
  0xbf   : > { %v585_v9 = vadd.f32 %v584_v36, %v583_v34  ;;  %v624_v39 = vrot.slane %v623_v38, 4 }
  0xc1   : > { %v586_v35 = vrot.slane %v585_v9, 1  ;;  %v625_v12 = vadd.f32 %v624_v39, %v623_v38 }
  0xc3   : > { %v587_v37 = vadd.f32 %v586_v35, %v585_v9  ;;  %v626_v27 = vrot.slane %v625_v12, 2 }
  0xc5   : > { %797 = vpush %v587_v37  ;;  %v627_v7 = vadd.f32 %v626_v27, %v625_v12 }
  0xc7   : > { %v628_v42 = vrot.slane %v627_v7, 1 }
  0xc9   : > { %v629_v45 = vadd.f32 %v628_v42, %v627_v7 }
  0xec   : > { %v597_v28 = vpop.xlane.xlu0 %596 }
  0xed   : > { %v598_v40 = vrot.slane %v597_v28, 4 }
  0xef   : > { %v599_v31 = vadd.f32 %v598_v40, %v597_v28 }
  0xf1   : > { %v600_v32 = vrot.slane %v599_v31, 2 }
  0xf3   : > { %v601_v41 = vadd.f32 %v600_v32, %v599_v31 }
  0xf5   : > { %v602_v43 = vrot.slane %v601_v41, 1 }
  0xf6   : > { %s798_s30 = spop %797 }
  0xf7   : > { %v603_v44 = vadd.f32 %v602_v43, %v601_v41 }
  0xf9   : > { %799 = vpush %v603_v44 }
  0xfa   : > { %801 = vpush %v629_v45 }
 0x12a   : > { %s800_s9 = spop %799 }
 0x12b   : > { %s605_s13 = sadd.f32 %s800_s9, %s798_s30  ;;  %s802_s14 = spop %801 }
 0x12c   : > { %v633_v46 = vstv %s802_s14 }
 0x12d   : > { %v631_v47 = vstv %s605_s13  ;;  %634 = vst [vmem:[%s360_s12] sm:$0xff] %v633_v46 }
 0x12e   : > { %632 = vst [vmem:[%s356_s8] sm:$0xff] %v631_v47 }
 0x12f PF: > { %s16_s22 = sadd.s32 1, %s906_s22   ;;  %s1109_s18 = smov %s894_s19 }
 0x130   : > { %p13_p11 = scmp.ge.s32.totalorder %s16_s22, 4   ;;  %s1110_s19 = smov %s974_s26 }
 0x131   : > { %s1111_s20 = smov %s902_s21  ;;  %s1112_s21 = smov %s1114_s23 }
 0x132   :  { %15 = sbr.rel (!%p13_p11) target bundleno = 3 (0x3), region = 123 }

</bundles_post_ra>
